<compile_context>
chip_gen: v6e
topology: v6e:2x2x1
jax: 0.10.0
libtpu: 0.0.40
codegen_flags: <defaults>
</compile_context>

<pallas_src>
import functools
import math

import jax
import jax.numpy as jnp
from jax.experimental import pallas as pl
from jax.experimental.pallas import tpu as pltpu


# ----------------------------- tiling helpers -------------------------------

TM_T = 512     # rows (sublane dim), multiple of 8
TN_T = 512     # output cols (lane dim), multiple of 128 (feeds 256-wide MXU)
TK_T = 512     # contraction, multiple of 128
TQ_T = 512     # attention query tile
TKV_T = 512    # attention key/value tile

VMEM_LIMIT = 48 * 1024 * 1024          # > 16/32 MiB scoped defaults, < v7x 64 MiB physical
ACC_BYTES_BUDGET = 4 * 1024 * 1024     # cap for a (tm, D) fp32 accumulator


def _tile(dim, target, base):
    """Largest multiple of `base` that divides `dim` and is <= target.
    Falls back to the full dim when `dim` is not a multiple of `base`."""
    if dim % base != 0:
        return dim
    t = max(base, (min(target, dim) // base) * base)
    while t > base and dim % t != 0:
        t -= base
    return t if dim % t == 0 else dim


def _tile_rows_for_full_width(M, D):
    """Row tile for kernels whose epilogue keeps the full feature width D
    resident (fp32 (tm, D) accumulator capped at ACC_BYTES_BUDGET)."""
    cap = max(8, (ACC_BYTES_BUDGET // (4 * D)) // 8 * 8)
    return _tile(M, min(TM_T, cap), 8)


def _kv_block_spec(shape, index_map):
    """K/V BlockSpec with 3-deep pipelining when this jax supports it."""
    try:
        return pl.BlockSpec(shape, index_map, pipeline_mode=pl.Buffered(3))
    except (AttributeError, TypeError):
        return pl.BlockSpec(shape, index_map)


# ------------------------- tiled linear (+ReLU) ------------------------------

def _linear_kernel(x_ref, w_ref, b_ref, o_ref, acc_ref, *, activation):
    k = pl.program_id(2)

    @pl.when(k == 0)
    def _():
        acc_ref[...] = jnp.zeros_like(acc_ref)

    acc_ref[...] += jnp.dot(x_ref[...].astype(jnp.bfloat16), w_ref[...],
                            preferred_element_type=jnp.float32)

    @pl.when(k == pl.num_programs(2) - 1)
    def _():
        y = acc_ref[...] + b_ref[...]
        if activation == "relu":
            y = jnp.maximum(y, 0.0)
        o_ref[...] = y.astype(o_ref.dtype)


def linear(x, w, b, activation="none"):
    M, K = x.shape
    N = w.shape[1]
    tm = _tile(M, TM_T, 8)
    tn = _tile(N, TN_T, 128)
    tk = _tile(K, TK_T, 128)
    return pl.pallas_call(
        functools.partial(_linear_kernel, activation=activation),
        grid=(M // tm, N // tn, K // tk),
        in_specs=[
            pl.BlockSpec((tm, tk), lambda i, j, k: (i, k)),
            pl.BlockSpec((tk, tn), lambda i, j, k: (k, j)),
            pl.BlockSpec((1, tn), lambda i, j, k: (0, j)),
        ],
        out_specs=pl.BlockSpec((tm, tn), lambda i, j, k: (i, j)),
        out_shape=jax.ShapeDtypeStruct((M, N), jnp.bfloat16),
        scratch_shapes=[pltpu.VMEM((tm, tn), jnp.float32)],
        compiler_params=pltpu.CompilerParams(
            dimension_semantics=("parallel", "parallel", "arbitrary"),
            vmem_limit_bytes=VMEM_LIMIT),
    )(x, w, b.reshape(1, N))


# -------------- tiled linear fused with residual-add + LayerNorm -------------

def _linear_res_ln_kernel(x_ref, w_ref, b_ref, r_ref, g_ref, be_ref,
                          o_ref, acc_ref):
    k = pl.program_id(1)

    @pl.when(k == 0)
    def _():
        acc_ref[...] = jnp.zeros_like(acc_ref)

    acc_ref[...] += jnp.dot(x_ref[...].astype(jnp.bfloat16), w_ref[...],
                            preferred_element_type=jnp.float32)

    @pl.when(k == pl.num_programs(1) - 1)
    def _():
        y = acc_ref[...] + b_ref[...] + r_ref[...].astype(jnp.float32)
        mean = jnp.mean(y, axis=-1, keepdims=True)
        var = jnp.mean((y - mean) ** 2, axis=-1, keepdims=True)
        yn = (y - mean) * jax.lax.rsqrt(var + 1e-5)
        o_ref[...] = (yn * g_ref[...] + be_ref[...]).astype(o_ref.dtype)


def linear_residual_layernorm(x, w, b, residual, gamma, beta):
    """o = LayerNorm(residual + x @ w + b).  N (=D) kept un-tiled so the LN
    statistics see the full feature row in the matmul epilogue; tm is clamped
    from D so the fp32 accumulator fits the VMEM budget."""
    M, K = x.shape
    D = w.shape[1]
    tm = _tile_rows_for_full_width(M, D)
    tk = _tile(K, TK_T, 128)
    return pl.pallas_call(
        _linear_res_ln_kernel,
        grid=(M // tm, K // tk),
        in_specs=[
            pl.BlockSpec((tm, tk), lambda i, k: (i, k)),
            pl.BlockSpec((tk, D), lambda i, k: (k, 0)),
            pl.BlockSpec((1, D), lambda i, k: (0, 0)),
            pl.BlockSpec((tm, D), lambda i, k: (i, 0)),
            pl.BlockSpec((1, D), lambda i, k: (0, 0)),
            pl.BlockSpec((1, D), lambda i, k: (0, 0)),
        ],
        out_specs=pl.BlockSpec((tm, D), lambda i, k: (i, 0)),
        out_shape=jax.ShapeDtypeStruct((M, D), jnp.bfloat16),
        scratch_shapes=[pltpu.VMEM((tm, D), jnp.float32)],
        compiler_params=pltpu.CompilerParams(
            dimension_semantics=("parallel", "arbitrary"),
            vmem_limit_bytes=VMEM_LIMIT),
    )(x, w, b.reshape(1, D), residual, gamma.reshape(1, D), beta.reshape(1, D))


# ---------------- fused FFN: w1 -> ReLU -> w2 (+residual +LN) ----------------

def _ffn_kernel(x_ref, w1_ref, b1_ref, w2_ref, b2_ref, g_ref, be_ref,
                o_ref, acc_ref):
    f = pl.program_id(1)

    @pl.when(f == 0)
    def _():
        acc_ref[...] = jnp.zeros_like(acc_ref)

    x = x_ref[...].astype(jnp.bfloat16)
    t = jnp.dot(x, w1_ref[...], preferred_element_type=jnp.float32) + b1_ref[...]
    t = jnp.maximum(t, 0.0).astype(jnp.bfloat16)     # (tm, tf) stays in VMEM
    acc_ref[...] += jnp.dot(t, w2_ref[...], preferred_element_type=jnp.float32)

    @pl.when(f == pl.num_programs(1) - 1)
    def _():
        y = acc_ref[...] + b2_ref[...] + x_ref[...].astype(jnp.float32)   # residual = x
        mean = jnp.mean(y, axis=-1, keepdims=True)
        var = jnp.mean((y - mean) ** 2, axis=-1, keepdims=True)
        yn = (y - mean) * jax.lax.rsqrt(var + 1e-5)
        o_ref[...] = (yn * g_ref[...] + be_ref[...]).astype(o_ref.dtype)


def ffn_residual_layernorm(x, w1, b1, w2, b2, gamma, beta):
    """o = LayerNorm(x + relu(x @ w1 + b1) @ w2 + b2).  The (tm, ffn)
    intermediate never leaves VMEM (no HBM round trip)."""
    M, D = x.shape
    F = w1.shape[1]
    tm = _tile_rows_for_full_width(M, D)
    tf = _tile(F, TN_T, 128)
    return pl.pallas_call(
        _ffn_kernel,
        grid=(M // tm, F // tf),
        in_specs=[
            pl.BlockSpec((tm, D), lambda i, f: (i, 0)),
            pl.BlockSpec((D, tf), lambda i, f: (0, f)),
            pl.BlockSpec((1, tf), lambda i, f: (0, f)),
            pl.BlockSpec((tf, D), lambda i, f: (f, 0)),
            pl.BlockSpec((1, D), lambda i, f: (0, 0)),
            pl.BlockSpec((1, D), lambda i, f: (0, 0)),
            pl.BlockSpec((1, D), lambda i, f: (0, 0)),
        ],
        out_specs=pl.BlockSpec((tm, D), lambda i, f: (i, 0)),
        out_shape=jax.ShapeDtypeStruct((M, D), jnp.bfloat16),
        scratch_shapes=[pltpu.VMEM((tm, D), jnp.float32)],
        compiler_params=pltpu.CompilerParams(
            dimension_semantics=("parallel", "arbitrary"),
            vmem_limit_bytes=VMEM_LIMIT),
    )(x, w1, b1.reshape(1, F), w2, b2.reshape(1, D),
      gamma.reshape(1, D), beta.reshape(1, D))


# ------------------- flash-style masked multi-head attention -----------------

def _attn_kernel(q_ref, k_ref, v_ref, qpad_ref, kpad_ref, o_ref,
                 qs_ref, m_ref, l_ref, acc_ref, *, num_heads, scale, tq, tkv):
    qi = pl.program_id(1)
    kj = pl.program_id(2)

    H = num_heads
    D = q_ref.shape[-1]
    Dh = D // H

    @pl.when(kj == 0)
    def _():
        m_ref[...] = jnp.full(m_ref.shape, -jnp.inf, dtype=m_ref.dtype)
        l_ref[...] = jnp.zeros_like(l_ref)
        acc_ref[...] = jnp.zeros_like(acc_ref)
        # hoist the lane-splitting head reshape of Q out of the kv loop
        # TODO(synk): pack two 64-wide heads per 128-lane slice for Dh < 128
        qs_ref[...] = q_ref[...].reshape(tq, H, Dh).astype(jnp.bfloat16)

    # skip kv tiles that lie entirely above the causal diagonal
    @pl.when(kj * tkv <= qi * tq + (tq - 1))
    def _():
        q = qs_ref[...]
        k = k_ref[...].reshape(tkv, H, Dh).astype(jnp.bfloat16)
        v = v_ref[...].reshape(tkv, H, Dh).astype(jnp.bfloat16)

        # scores per head: (H, tq, tkv), fp32
        s = jnp.einsum("qhd,khd->hqk", q, k,
                       preferred_element_type=jnp.float32) * scale

        # causal + pad mask built in-kernel from O(S) data
        q_pos = qi * tq + jax.lax.broadcasted_iota(jnp.int32, (tq, tkv), 0)
        k_pos = kj * tkv + jax.lax.broadcasted_iota(jnp.int32, (tq, tkv), 1)
        q_ok = qpad_ref[0] > 0.5          # (tq, 1)
        k_ok = kpad_ref[0] > 0.5          # (1, tkv)
        allowed = (k_pos <= q_pos) & q_ok & k_ok          # (tq, tkv)
        s = jnp.where(allowed[None, :, :], s, -1e9)

        # online softmax update (fp32 statistics; exp stays fp32 — v5e has no bf16 EUP)
        m_prev = m_ref[...]
        m_new = jnp.maximum(m_prev, jnp.max(s, axis=-1, keepdims=True))
        alpha = jnp.exp(m_prev - m_new)
        p = jnp.exp(s - m_new)
        l_ref[...] = alpha * l_ref[...] + jnp.sum(p, axis=-1, keepdims=True)
        acc_ref[...] = alpha * acc_ref[...] + jnp.einsum(
            "hqk,khd->hqd", p.astype(jnp.bfloat16), v,
            preferred_element_type=jnp.float32)
        m_ref[...] = m_new

    @pl.when(kj == pl.num_programs(2) - 1)
    def _():
        inv_l = pl.reciprocal(l_ref[...], approx=True)
        out = acc_ref[...] * inv_l                      # (H, tq, Dh)
        o_ref[...] = out.transpose(1, 0, 2).reshape(tq, D).astype(o_ref.dtype)


def attention(qkv, pad_q, pad_kv, *, B, S, D, H, scale):
    """qkv: [B*S, 3D] (fused projection, bf16).  Returns [B*S, D] bf16 (heads
    merged, lane-dense).  Q/K/V slicing is done via BlockSpec index_maps,
    pad+causal mask is generated in-kernel, fully-causal-masked kv tiles are
    skipped."""
    tq = _tile(S, TQ_T, 8)
    tkv = _tile(S, TKV_T, 128)
    nq = S // tq
    nkv = S // tkv
    Dh = D // H

    return pl.pallas_call(
        functools.partial(_attn_kernel, num_heads=H, scale=scale, tq=tq, tkv=tkv),
        grid=(B, nq, nkv),
        in_specs=[
            # q / k / v are column slices 0 / 1 / 2 of the fused qkv slab
            pl.BlockSpec((tq, D), lambda b, qi, kj: (b * nq + qi, 0)),
            _kv_block_spec((tkv, D), lambda b, qi, kj: (b * nkv + kj, 1)),
            _kv_block_spec((tkv, D), lambda b, qi, kj: (b * nkv + kj, 2)),
            pl.BlockSpec((1, tq, 1), lambda b, qi, kj: (b, qi, 0)),   # query pad
            pl.BlockSpec((1, 1, tkv), lambda b, qi, kj: (b, 0, kj)),  # key pad
        ],
        out_specs=pl.BlockSpec((tq, D), lambda b, qi, kj: (b * nq + qi, 0)),
        out_shape=jax.ShapeDtypeStruct((B * S, D), jnp.bfloat16),
        scratch_shapes=[
            pltpu.VMEM((tq, H, Dh), jnp.bfloat16),  # cached head-split Q
            pltpu.VMEM((H, tq, 1), jnp.float32),    # running max
            pltpu.VMEM((H, tq, 1), jnp.float32),    # running sum
            pltpu.VMEM((H, tq, Dh), jnp.float32),   # output accumulator
        ],
        compiler_params=pltpu.CompilerParams(
            dimension_semantics=("parallel", "parallel", "arbitrary"),
            vmem_limit_bytes=VMEM_LIMIT),
    )(qkv, qkv, qkv, pad_q, pad_kv)


# -------------- generator: vocab-tiled matmul with online logsumexp ----------

def _generator_kernel(x_ref, w_ref, b_ref, logits_ref, lse_ref,
                      acc_ref, m_ref, l_ref):
    j = pl.program_id(1)
    k = pl.program_id(2)
    nj = pl.num_programs(1)
    nk = pl.num_programs(2)

    @pl.when(k == 0)
    def _():
        acc_ref[...] = jnp.zeros_like(acc_ref)

    acc_ref[...] += jnp.dot(x_ref[...].astype(jnp.bfloat16), w_ref[...],
                            preferred_element_type=jnp.float32)

    @pl.when(k == nk - 1)
    def _():
        # logits stored bf16 (halves the [M, V] HBM round trip); lse is
        # computed from the *rounded* values so exp(logp) still sums to 1.
        logits_b = (acc_ref[...] + b_ref[...]).astype(jnp.bfloat16)
        logits_ref[...] = logits_b
        lf = logits_b.astype(jnp.float32)

        @pl.when(j == 0)
        def _():
            m_ref[...] = jnp.full(m_ref.shape, -jnp.inf, dtype=m_ref.dtype)
            l_ref[...] = jnp.zeros_like(l_ref)

        m_prev = m_ref[...]
        m_new = jnp.maximum(m_prev, jnp.max(lf, axis=-1, keepdims=True))
        l_ref[...] = l_ref[...] * jnp.exp(m_prev - m_new) + \
            jnp.sum(jnp.exp(lf - m_new), axis=-1, keepdims=True)
        m_ref[...] = m_new

        @pl.when(j == nj - 1)
        def _():
            lse_ref[...] = m_ref[...] + jnp.log(l_ref[...])


def generator_logits_lse(x, w, b):
    # TODO(synk): split the vocab axis across v7x's two TensorCores (per-core
    # partial m/l merged in the subtract kernel) when M // tm == 1.
    M, K = x.shape
    V = w.shape[1]
    tm = _tile(M, TM_T, 8)
    tv = _tile(V, TN_T, 128)
    tk = _tile(K, TK_T, 128)
    return pl.pallas_call(
        _generator_kernel,
        grid=(M // tm, V // tv, K // tk),
        in_specs=[
            pl.BlockSpec((tm, tk), lambda i, j, k: (i, k)),
            pl.BlockSpec((tk, tv), lambda i, j, k: (k, j)),
            pl.BlockSpec((1, tv), lambda i, j, k: (0, j)),
        ],
        out_specs=[
            pl.BlockSpec((tm, tv), lambda i, j, k: (i, j)),
            pl.BlockSpec((tm, 1), lambda i, j, k: (i, 0)),
        ],
        out_shape=(jax.ShapeDtypeStruct((M, V), jnp.bfloat16),
                   jax.ShapeDtypeStruct((M, 1), jnp.float32)),
        scratch_shapes=[
            pltpu.VMEM((tm, tv), jnp.float32),   # matmul accumulator
            pltpu.VMEM((tm, 1), jnp.float32),    # running max
            pltpu.VMEM((tm, 1), jnp.float32),    # running sum
        ],
        compiler_params=pltpu.CompilerParams(
            dimension_semantics=("parallel", "arbitrary", "arbitrary"),
            vmem_limit_bytes=VMEM_LIMIT),
    )(x, w, b.reshape(1, V))


def _logsub_kernel(logits_ref, lse_ref, o_ref):
    o_ref[...] = logits_ref[...].astype(jnp.float32) - lse_ref[...]


def subtract_lse(logits, lse):
    M, V = logits.shape
    tm = _tile(M, TM_T, 8)
    tv = _tile(V, TN_T, 128)
    return pl.pallas_call(
        _logsub_kernel,
        grid=(M // tm, V // tv),
        in_specs=[
            pl.BlockSpec((tm, tv), lambda i, j: (i, j)),
            pl.BlockSpec((tm, 1), lambda i, j: (i, 0)),
        ],
        out_specs=pl.BlockSpec((tm, tv), lambda i, j: (i, j)),
        out_shape=jax.ShapeDtypeStruct((M, V), jnp.float32),
        compiler_params=pltpu.CompilerParams(
            dimension_semantics=("parallel", "parallel"),
            vmem_limit_bytes=VMEM_LIMIT),
    )(logits, lse)


# ----------------------------- parameters / glue -----------------------------

def sinusoidal_pe(max_seq_len, d):
    pos = jnp.arange(max_seq_len, dtype=jnp.float32)[:, None]
    div = jnp.exp(jnp.arange(0, d, 2, dtype=jnp.float32) * (-math.log(10000.0) / d))
    pe = jnp.zeros((max_seq_len, d), dtype=jnp.float32)
    pe = pe.at[:, 0::2].set(jnp.sin(pos * div))
    pe = pe.at[:, 1::2].set(jnp.cos(pos * div))
    return pe


def init_params(key, *, vocab_size, embed_dim, num_heads, num_layers,
                ffn_dim, max_seq_len):
    def w_bf16(k, shape):          # weights stored bf16 (MXU operands)
        return (0.02 * jax.random.normal(k, shape, dtype=jnp.float32)).astype(jnp.bfloat16)

    # pad vocab to a multiple of 128 so the generator vocab tiling never
    # degenerates to a (tm, V) accumulator; padded logits are masked via bias.
    vp = ((vocab_size + 127) // 128) * 128
    keys = jax.random.split(key, 2 + num_layers)
    gw = jnp.pad(w_bf16(keys[1], (embed_dim, vocab_size)),
                 ((0, 0), (0, vp - vocab_size)))
    gb = jnp.zeros((vp,), jnp.float32).at[vocab_size:].set(-1e9)

    params = {
        "num_heads": num_heads,
        "vocab_size": vocab_size,
        "te": 0.02 * jax.random.normal(keys[0], (vocab_size, embed_dim), dtype=jnp.float32),
        "pe": sinusoidal_pe(max_seq_len, embed_dim),
        "gw": gw,
        "gb": gb,
        "layers": [],
    }
    for l in range(num_layers):
        ks = jax.random.split(keys[2 + l], 4)
        params["layers"].append({
            "w_qkv": w_bf16(ks[0], (embed_dim, 3 * embed_dim)),
            "b_qkv": jnp.zeros((3 * embed_dim,), jnp.float32),
            "wo": w_bf16(ks[1], (embed_dim, embed_dim)),
            "bo": jnp.zeros((embed_dim,), jnp.float32),
            "w1": w_bf16(ks[2], (embed_dim, ffn_dim)),
            "b1": jnp.zeros((ffn_dim,), jnp.float32),
            "w2": w_bf16(ks[3], (ffn_dim, embed_dim)),
            "b2": jnp.zeros((embed_dim,), jnp.float32),
            "ln1_g": jnp.ones((embed_dim,), jnp.float32),
            "ln1_b": jnp.zeros((embed_dim,), jnp.float32),
            "ln2_g": jnp.ones((embed_dim,), jnp.float32),
            "ln2_b": jnp.zeros((embed_dim,), jnp.float32),
        })
    return params


def transformer_forward(params, tgt):
    B, S = tgt.shape
    D = params["pe"].shape[1]
    H = params["num_heads"]
    V = params["vocab_size"]
    scale = 1.0 / math.sqrt(D // H)

    # embedding lookup + positional encoding (plain-JAX glue: a vocab gather
    # has no clean rectangular BlockSpec; keep it in XLA)
    # TODO(synk): TokenEmbedding may apply a sqrt(d_model) scale; spec not given.
    x = params["te"][tgt] + params["pe"][:S][None, :, :]          # (B, S, D) fp32

    # O(S) pad vectors; the (pad & causal) mask is generated inside the kernel
    pad = (tgt != 0).astype(jnp.float32)
    pad_q = pad.reshape(B, S, 1)
    pad_kv = pad.reshape(B, 1, S)

    # bf16 activations at every kernel boundary (fp32 stays inside kernels)
    h = x.reshape(B * S, D).astype(jnp.bfloat16)
    for lp in params["layers"]:
        qkv = linear(h, lp["w_qkv"], lp["b_qkv"])                 # fused QKV: (M, 3D)
        a = attention(qkv, pad_q, pad_kv, B=B, S=S, D=D, H=H, scale=scale)
        h = linear_residual_layernorm(a, lp["wo"], lp["bo"],
                                      h, lp["ln1_g"], lp["ln1_b"])   # post-norm
        h = ffn_residual_layernorm(h, lp["w1"], lp["b1"], lp["w2"], lp["b2"],
                                   lp["ln2_g"], lp["ln2_b"])         # fused FFN

    decoder_out = h.astype(jnp.float32).reshape(B, S, D)
    logits, lse = generator_logits_lse(h, params["gw"], params["gb"])
    logp = subtract_lse(logits, lse)[:, :V].reshape(B, S, V)
    return logp, decoder_out


# ------------------------------------ main -----------------------------------

if __name__ == "__main__":
    # Small shapes consistent with the module's forward (D kept at 128 so the
    # per-head column slices stay lane-aligned).
    B, S = 2, 8
    D, H, L = 128, 4, 2
    V = 256
    FFN = 2 * D
    MAX_SEQ = 64

    key = jax.random.PRNGKey(0)
    pkey, tkey = jax.random.split(key)
    params = init_params(pkey, vocab_size=V, embed_dim=D, num_heads=H,
                         num_layers=L, ffn_dim=FFN, max_seq_len=MAX_SEQ)

    tgt = jax.random.randint(tkey, (B, S), 0, V, dtype=jnp.int32)
    tgt = tgt.at[0, -2:].set(0)   # include some pad (0) tokens so the pad mask matters

    logp, dec = transformer_forward(params, tgt)
    jax.block_until_ready((logp, dec))

    assert logp.shape == (B, S, V) and dec.shape == (B, S, D)
    # log_softmax rows should sum to ~1 in prob space
    assert bool(jnp.all(jnp.abs(jnp.sum(jnp.exp(logp), axis=-1) - 1.0) < 1e-3))
    print("KERNEL_OK")
</pallas_src>

<mosaic_0001>
module attributes {stable_mosaic.version = 11 : i64} {
  func.func @_linear_kernel(%arg0: i32, %arg1: i32, %arg2: i32, %arg3: memref<16x128xbf16, #tpu.memory_space<vmem>>, %arg4: memref<128x384xbf16, #tpu.memory_space<vmem>>, %arg5: memref<1x384xf32, #tpu.memory_space<vmem>>, %arg6: memref<16x384xbf16, #tpu.memory_space<vmem>>, %arg7: memref<16x384xf32, #tpu.memory_space<vmem>>) attributes {dimension_semantics = [#tpu.dimension_semantics<parallel>, #tpu.dimension_semantics<parallel>, #tpu.dimension_semantics<arbitrary>], iteration_bounds = array<i64: 1, 1, 1>, scalar_prefetch = 0 : i64, scratch_operands = 1 : i64, tpu.core_type = #tpu.core_type<tc>, window_params = [{transform_indices = @transform_0, window_bounds = array<i64: 16, 128>}, {transform_indices = @transform_1, window_bounds = array<i64: 128, 384>}, {transform_indices = @transform_2, window_bounds = array<i64: 1, 384>}, {transform_indices = @transform_3, window_bounds = array<i64: 16, 384>}]} {
    %c0_i32 = arith.constant 0 : i32
    %0 = arith.cmpi eq, %arg2, %c0_i32 : i32
    %1 = arith.extui %0 : i1 to i32
    %c0_i32_0 = arith.constant 0 : i32
    %2 = arith.cmpi ne, %1, %c0_i32_0 : i32
    scf.if %2 {
      %cst_10 = arith.constant 0.000000e+00 : f32
      %12 = vector.broadcast %cst_10 : f32 to vector<16x384xf32>
      %c0_11 = arith.constant 0 : index
      %c0_12 = arith.constant 0 : index
      %13 = vector.load %arg7[%c0_11, %c0_12] : memref<16x384xf32, #tpu.memory_space<vmem>>, vector<16x384xf32>
      tpu.vector_store %arg7[%c0_11, %c0_12], %12 {strides = array<i32>} : memref<16x384xf32, #tpu.memory_space<vmem>>, vector<16x384xf32>,
    } else {
    }
    %c0 = arith.constant 0 : index
    %c0_1 = arith.constant 0 : index
    %3 = vector.load %arg7[%c0, %c0_1] : memref<16x384xf32, #tpu.memory_space<vmem>>, vector<16x384xf32>
    %c0_2 = arith.constant 0 : index
    %c0_3 = arith.constant 0 : index
    %4 = vector.load %arg3[%c0_2, %c0_3] : memref<16x128xbf16, #tpu.memory_space<vmem>>, vector<16x128xbf16>
    %c0_4 = arith.constant 0 : index
    %c0_5 = arith.constant 0 : index
    %5 = vector.load %arg4[%c0_4, %c0_5] : memref<128x384xbf16, #tpu.memory_space<vmem>>, vector<128x384xbf16>
    %cst = arith.constant dense<0.000000e+00> : vector<16x384xf32>
    %6 = tpu.matmul %4, %5, %cst {dimension_numbers = #tpu.dot_dimension_numbers<[1], [0], [0], [1], [0, 0, 1, 1], [], []>} : vector<16x128xbf16>, vector<128x384xbf16>, vector<16x384xf32> -> vector<16x384xf32>
    %7 = arith.addf %3, %6 : vector<16x384xf32>
    %c0_6 = arith.constant 0 : index
    %c0_7 = arith.constant 0 : index
    %8 = vector.load %arg7[%c0_6, %c0_7] : memref<16x384xf32, #tpu.memory_space<vmem>>, vector<16x384xf32>
    tpu.vector_store %arg7[%c0_6, %c0_7], %7 {strides = array<i32>} : memref<16x384xf32, #tpu.memory_space<vmem>>, vector<16x384xf32>,
    %c0_i32_8 = arith.constant 0 : i32
    %9 = arith.cmpi eq, %arg2, %c0_i32_8 : i32
    %10 = arith.extui %9 : i1 to i32
    %c0_i32_9 = arith.constant 0 : i32
    %11 = arith.cmpi ne, %10, %c0_i32_9 : i32
    scf.if %11 {
      %c0_10 = arith.constant 0 : index
      %c0_11 = arith.constant 0 : index
      %12 = vector.load %arg7[%c0_10, %c0_11] : memref<16x384xf32, #tpu.memory_space<vmem>>, vector<16x384xf32>
      %c0_12 = arith.constant 0 : index
      %c0_13 = arith.constant 0 : index
      %13 = vector.load %arg5[%c0_12, %c0_13] : memref<1x384xf32, #tpu.memory_space<vmem>>, vector<1x384xf32>
      %14 = vector.broadcast %13 : vector<1x384xf32> to vector<16x384xf32>
      %15 = arith.addf %12, %14 : vector<16x384xf32>
      %16 = arith.truncf %15 : vector<16x384xf32> to vector<16x384xbf16>
      %c0_14 = arith.constant 0 : index
      %c0_15 = arith.constant 0 : index
      %17 = vector.load %arg6[%c0_14, %c0_15] : memref<16x384xbf16, #tpu.memory_space<vmem>>, vector<16x384xbf16>
      tpu.vector_store %arg6[%c0_14, %c0_15], %16 {strides = array<i32>} : memref<16x384xbf16, #tpu.memory_space<vmem>>, vector<16x384xbf16>,
    } else {
    }
    return
  }
  func.func @transform_0(%arg0: i32, %arg1: i32, %arg2: i32) -> (i32, i32) {
    %c0_i32 = arith.constant 0 : i32
    return %arg0, %arg2 : i32, i32
  }
  func.func @transform_1(%arg0: i32, %arg1: i32, %arg2: i32) -> (i32, i32) {
    %c0_i32 = arith.constant 0 : i32
    return %arg2, %arg1 : i32, i32
  }
  func.func @transform_2(%arg0: i32, %arg1: i32, %arg2: i32) -> (i32, i32) {
    %c0_i32 = arith.constant 0 : i32
    %c0_i32_0 = arith.constant 0 : i32
    return %c0_i32, %arg1 : i32, i32
  }
  func.func @transform_3(%arg0: i32, %arg1: i32, %arg2: i32) -> (i32, i32) {
    %c0_i32 = arith.constant 0 : i32
    return %arg0, %arg1 : i32, i32
  }
}

</mosaic_0001>

<bundles_post_ra>
// kernel: tpu_custom_call.1
= control target key start
LH: loop header
LB: loop body
LE: loop exit
PB: predicated region body
PF: predicated region fallthrough
CT: control target
= control target key end

     0   :  { %8 = vsyncpa [#allocation4], 0  ;;  %s617_s0 = inlined_call_operand.hbm [shape: bf16[16,128], index: 0, kind: input, shape index: {}]   ;;  %s618_s1 = inlined_call_operand.hbm [shape: bf16[128,384], index: 1, kind: input, shape index: {}]   ;;  %s619_s2 = inlined_call_operand.vmem [shape: f32[1,384], index: 2, kind: input, shape index: {}]   ;;  %s620_s3 = inlined_call_operand.hbm [shape: bf16[16,384], index: 3, kind: output, shape index: {}]  }
   0x1   :  { %9 = vsyncpa [#allocation7], 0 }
   0x2   :  { %10 = vsyncpa [#allocation5], 0  ;;  %s569_s12 = smov [#allocation3]  }
   0x3   :  { %s16_s13 = sshll.u32 %s569_s12, 4  ;;  %s17_s13 = int_to_ptr.vmem [resolvable:$true] %s16_s13 }
   0x4   :  { %s511_s14 = scalar_lea.vmem %s17_s13, 128  ;;  %p516_p1 = scmp.lt.s32.totalorder %s17_s13, %s17_s13 }
   0x5   :  { %p512_p0 = scmp.ne.s32.totalorder %s17_s13, %s511_s14  ;;  %p517_p2 = scmp.lt.s32.totalorder %s511_s14, %s511_s14 }
   0x7   :  { %p518_p3 = por %p517_p2, %p516_p1 }
   0x9   :  { %p519_p4 = pnand %p518_p3, %p512_p0 }
   0xb   :  { %522 = shalt.err (!%p519_p4)
}
   0xc   :  { %s570_s15 = smov 64   ;;  %s571_s16 = smov 4  }
   0xd   :  { %22 = dma.hbm_to_vmem [thread:$0]  %s617_s0, 128, %s17_s13, [#allocation4], %s570_s15, %s570_s15, %s571_s16  }
   0xe   :  { %s572_s19 = smov [#allocation6]  }
   0xf   :  { %s28_s20 = sshll.u32 %s572_s19, 4  ;;  %s29_s20 = int_to_ptr.vmem [resolvable:$true] %s28_s20 }
  0x10   :  { %s531_s21 = scalar_lea.vmem %s29_s20, 3072  ;;  %p536_p6 = scmp.lt.s32.totalorder %s29_s20, %s29_s20 }
  0x11   :  { %p532_p5 = scmp.ne.s32.totalorder %s29_s20, %s531_s21  ;;  %p537_p7 = scmp.lt.s32.totalorder %s531_s21, %s531_s21 }
  0x13   :  { %p538_p8 = por %p537_p7, %p536_p6 }
  0x15   :  { %p539_p9 = pnand %p538_p8, %p532_p5 }
  0x17   :  { %542 = shalt.err (!%p539_p9)
}
  0x18   :  { %s573_s22 = smov 192   ;;  %s574_s23 = smov 12  }
  0x19   :  { %34 = dma.hbm_to_vmem [thread:$0]  %s618_s1, 3072, %s29_s20, [#allocation7], %s573_s22, %s573_s22, %s574_s23  }
  0x1a   :  { %563 = dma.done.wait [#allocation4], 128  }
  0x1b   :  { %564 = vsyncadd [#allocation4], 4294967168 }
  0x1c   :  { %565 = dma.done.wait [#allocation7], 3072  }
  0x1d   :  { %566 = vsyncadd [#allocation7], 4294964224  ;;  %v575_v0 = vmov 0.0   ;;  %vm576_vm0 = vmmov 0   ;;  %v577_v1 = vmov 0   ;;  %v502_v26 = vld [vmem:[#allocation3] sm:$0xff]   ;;  %v335_v27 = vlaneseq }
  0x1e   :  { %440 = vmatprep.subr.bf16.mxu1 %v575_v0  ;;  %456 = vmatprep.mubr.msk.bf16.mxu1 %vm576_vm0, %v575_v0  ;;  %v470_v2 = vld [vmem:[#allocation6 + $0xac] ss:$12 sps:$4 sm:$0xff]   ;;  %v472_v3 = vld [vmem:[#allocation6 + $0xb0] ss:$12 sps:$4 sm:$0xff]   ;;  %v473_v4 = vld [vmem:[#allocation6 + $0xa8] ss:$12 sps:$4 sm:$0xff]  }
  0x1f   :  { %260 = vmatprep.mubr.bf16.mxu0 %v577_v1  ;;  %228 = vmatprep.subr.bf16.mxu0 %v470_v2  ;;  %v474_v5 = vld [vmem:[#allocation6 + $0x94] ss:$12 sps:$4 sm:$0xff]   ;;  %v476_v6 = vld [vmem:[#allocation6 + $0x98] ss:$12 sps:$4 sm:$0xff]   ;;  %v477_v7 = vld [vmem:[#allocation6 + $0x90] ss:$12 sps:$4 sm:$0xff]  }
  0x20   :  { %441 = vmatpush3.bf16.msra.mxu1 %v472_v3  ;;  %229 = vmatpush1.bf16.msra.mxu0 %v473_v4  ;;  %v478_v8 = vld [vmem:[#allocation6 + $0x7c] ss:$12 sps:$4 sm:$0xff]   ;;  %v480_v9 = vld [vmem:[#allocation6 + $0x80] ss:$12 sps:$4 sm:$0xff]   ;;  %v481_v10 = vld [vmem:[#allocation6 + $0x78] ss:$12 sps:$4 sm:$0xff]  }
  0x21   :  { %442 = vmatprep.subr.bf16.mxu1 %v575_v0  ;;  %230 = vmatprep.subr.bf16.mxu0 %v474_v5  ;;  %v482_v11 = vld [vmem:[#allocation6 + $0x64] ss:$12 sps:$4 sm:$0xff]   ;;  %v484_v12 = vld [vmem:[#allocation6 + $0x68] ss:$12 sps:$4 sm:$0xff]   ;;  %v485_v13 = vld [vmem:[#allocation6 + $0x60] ss:$12 sps:$4 sm:$0xff]  }
  0x22   :  { %v486_v14 = vld [vmem:[#allocation6 + $0x4c] ss:$12 sps:$4 sm:$0xff]   ;;  %v488_v15 = vld [vmem:[#allocation6 + $0x50] ss:$12 sps:$4 sm:$0xff]   ;;  %v489_v16 = vld [vmem:[#allocation6 + $0x48] ss:$12 sps:$4 sm:$0xff]  }
  0x23   :  { %v490_v17 = vld [vmem:[#allocation6 + $0x34] ss:$12 sps:$4 sm:$0xff]   ;;  %v492_v18 = vld [vmem:[#allocation6 + $0x38] ss:$12 sps:$4 sm:$0xff]   ;;  %v493_v19 = vld [vmem:[#allocation6 + $0x30] ss:$12 sps:$4 sm:$0xff]  }
  0x24   :  { %443 = vmatpush3.bf16.msra.mxu1 %v476_v6  ;;  %231 = vmatpush1.bf16.msra.mxu0 %v477_v7  ;;  %v494_v20 = vld [vmem:[#allocation6 + $0x1c] ss:$12 sps:$4 sm:$0xff]   ;;  %v496_v21 = vld [vmem:[#allocation6 + $0x20] ss:$12 sps:$4 sm:$0xff]   ;;  %v497_v22 = vld [vmem:[#allocation6 + $0x18] ss:$12 sps:$4 sm:$0xff]  }
  0x25   :  { %444 = vmatprep.subr.bf16.mxu1 %v575_v0  ;;  %232 = vmatprep.subr.bf16.mxu0 %v478_v8  ;;  %v498_v23 = vld [vmem:[#allocation6 + $0x4] ss:$12 sps:$4 sm:$0xff]   ;;  %v500_v24 = vld [vmem:[#allocation6 + $0x8] ss:$12 sps:$4 sm:$0xff]   ;;  %v501_v25 = vld [vmem:[#allocation6] ss:$12 sps:$4 sm:$0xff]  }
  0x26   :  { %v336_v28 = vshrl.u32 %v335_v27, 7  ;;  %v333_v30 = vld [vmem:[%s619_s2] sm:$0x7]  ;;  %s578_s2 = smov [#allocation8]  }
  0x27   :  { %s385_s26 = sshll.u32 %s578_s2, 4  ;;  %s386_s26 = int_to_ptr.vmem [resolvable:$true] %s385_s26 }
  0x28   :  { %445 = vmatpush3.bf16.msra.mxu1 %v480_v9  ;;  %233 = vmatpush1.bf16.msra.mxu0 %v481_v10  ;;  %v345_v29 = vsub.s32 2, %v336_v28  ;;  %v337_v31 = vsub.s32 0, %v336_v28  ;;  %v341_v32 = vsub.s32 1, %v336_v28  ;;  %s543_s27 = scalar_lea.vmem %s386_s26, 384  ;;  %p548_p11 = scmp.lt.s32.totalorder %s386_s26, %s386_s26 }
  0x29   :  { %446 = vmatprep.subr.bf16.mxu1 %v575_v0  ;;  %234 = vmatprep.subr.bf16.mxu0 %v482_v11  ;;  %p544_p10 = scmp.ne.s32.totalorder %s386_s26, %s543_s27  ;;  %p549_p12 = scmp.lt.s32.totalorder %s543_s27, %s543_s27 }
  0x2a   :  { %v346_v33 = vrot.slane %v333_v30, %v345_v29  ;;  %v338_v35 = vrot.slane %v333_v30, %v337_v31  ;;  %v342_v36 = vrot.slane %v333_v30, %v341_v32 }
  0x2b   :  { %p550_p13 = por %p549_p12, %p548_p11 }
  0x2c   :  { %447 = vmatpush3.bf16.msra.mxu1 %v484_v12  ;;  %235 = vmatpush1.bf16.msra.mxu0 %v485_v13 }
  0x2d   :  { %448 = vmatprep.subr.bf16.mxu1 %v575_v0  ;;  %236 = vmatprep.subr.bf16.mxu0 %v486_v14  ;;  %p551_p0 = pnand %p550_p13, %p544_p10 }
  0x30   :  { %449 = vmatpush3.bf16.msra.mxu1 %v488_v15  ;;  %237 = vmatpush1.bf16.msra.mxu0 %v489_v16 }
  0x31   :  { %450 = vmatprep.subr.bf16.mxu1 %v575_v0  ;;  %238 = vmatprep.subr.bf16.mxu0 %v490_v17 }
  0x34   :  { %451 = vmatpush3.bf16.msra.mxu1 %v492_v18  ;;  %239 = vmatpush1.bf16.msra.mxu0 %v493_v19 }
  0x35   :  { %452 = vmatprep.subr.bf16.mxu1 %v575_v0  ;;  %240 = vmatprep.subr.bf16.mxu0 %v494_v20 }
  0x38   :  { %453 = vmatpush3.bf16.msra.mxu1 %v496_v21  ;;  %241 = vmatpush1.bf16.msra.mxu0 %v497_v22 }
  0x39   :  { %454 = vmatprep.subr.bf16.mxu1 %v575_v0  ;;  %242 = vmatprep.subr.bf16.mxu0 %v498_v23 }
  0x3c   :  { %455 = vmatpush3.bf16.msra.mxu1 %v500_v24  ;;  %243 = vmatpush1.bf16.msra.mxu0 %v501_v25 }
  0x3f   :  { %457 = vmatmul.mubr.bf16.vlgmr.msra.gmra.mxu1 %v502_v26  ;;  %261 = vmatmul.mubr.bf16.vlgmr.msra.gmra.mxu0 %v502_v26 }
  0xff   :  { %v305_v34 = vpop.f32.mrf.mxu1  ;;  %v262_v38 = vpop.f32.mrf.mxu0 }
 0x100   :  { %v352_v37 = vadd.f32 %v346_v33, %v305_v34  ;;  %v350_v42 = vadd.f32 %v338_v35, %v262_v38 }
 0x101   :  { %v458_v39 = vpop.f32.mrf.mxu1  ;;  %v264_v41 = vpop.f32.mrf.mxu0 }
 0x102   :  { %v428_v40 = vpack.c.bf16 %v352_v37, %v352_v37  ;;  %v351_v43 = vadd.f32 %v342_v36, %v264_v41 }
 0x103   :  { %v308_v44 = vpop.f32.mrf.mxu1  ;;  %v266_v46 = vpop.f32.mrf.mxu0 }
 0x104   :  { %377 = vst [vmem:[#allocation8 + $0x8] sm:$0xf] %v428_v40  ;;  %v355_v45 = vadd.f32 %v346_v33, %v308_v44  ;;  %v427_v47 = vpack.c.bf16 %v351_v43, %v350_v42  ;;  %v353_v51 = vadd.f32 %v338_v35, %v266_v46 }
 0x105   :  { %v459_v48 = vpop.f32.mrf.mxu1  ;;  %v268_v50 = vpop.f32.mrf.mxu0 }
 0x106   :  { %v430_v49 = vpack.c.bf16 %v355_v45, %v355_v45  ;;  %376 = vst [vmem:[#allocation8] sm:$0xff] %v427_v47  ;;  %v354_v52 = vadd.f32 %v342_v36, %v268_v50 }
 0x108   :  { %379 = vst [vmem:[#allocation8 + $0x14] sm:$0xf] %v430_v49  ;;  %v429_v53 = vpack.c.bf16 %v354_v52, %v353_v51 }
 0x10a   :  { %378 = vst [vmem:[#allocation8 + $0xc] sm:$0xff] %v429_v53 }
 0x10b   :  { %554 = shalt.err (!%p551_p0)
}
 0x10c   :  { %391 = dma.vmem_to_hbm [thread:$0]  %s386_s26, 384, %s620_s3, [#allocation5], %s573_s22, %s573_s22, %s574_s23  }
 0x10d   :  { %567 = dma.done.wait [#allocation5], 384  }
 0x10e   :  { %568 = vsyncadd [#allocation5], 4294966912 }
 0x10f   :  { %395 = vsyncpa [#allocation4], 1 }
 0x110   :  { %396 = vsyncpa [#allocation7], 1 }
 0x111   :  { %397 = vsyncpa [#allocation5], 1 }

</bundles_post_ra>
